<compile_context>
chip_gen: v7x
topology: tpu7x:2x2x1
jax: 0.10.0
libtpu: 0.0.40
codegen_flags: <defaults>
</compile_context>

<pallas_src>
import functools
import math

import jax
import jax.numpy as jnp
from jax import lax
from jax.experimental import pallas as pl
from jax.experimental.pallas import tpu as pltpu


# Tiles sized so (double-buffered inputs + outputs + scratch) stay well under
# the scoped-VMEM budget on every chip (v7x: 64 MiB physical / 32 MiB scoped).
_VMEM_LIMIT = 32 * 1024 * 1024
_LINEAR_BLOCK_M = 512      # rows of x per program in the linear kernel
_ATTN_BLOCK_Q = 128        # q rows per program in the attention kernel
_ATTN_BLOCK_K = 128        # kv rows per inner (arbitrary) grid step


# ----------------------------------------------------------------------------
# Kernel 1: linear layer  y = x @ W + b,   tiled over rows of x.
#   x: (M, IN)  W: (IN, OUT)  b: (1, OUT)  ->  y: (M, OUT)
# Weights/bias stay VMEM-resident across the M grid; x / y tiles are
# double-buffered by the BlockSpec pipeline.
# ----------------------------------------------------------------------------
def _linear_kernel(x_ref, w_ref, b_ref, o_ref):
    acc = jnp.dot(x_ref[...], w_ref[...], preferred_element_type=jnp.float32)
    o_ref[...] = (acc + b_ref[...]).astype(o_ref.dtype)


def linear(x, w, b, *, block_m=_LINEAR_BLOCK_M):
    m, kin = x.shape
    out = w.shape[1]
    tm = min(block_m, m)
    return pl.pallas_call(
        _linear_kernel,
        out_shape=jax.ShapeDtypeStruct((m, out), x.dtype),
        grid=(pl.cdiv(m, tm),),
        in_specs=[
            pl.BlockSpec((tm, kin), lambda i: (i, 0)),
            pl.BlockSpec((kin, out), lambda i: (0, 0)),   # weights resident
            pl.BlockSpec((1, out), lambda i: (0, 0)),     # bias resident
        ],
        out_specs=pl.BlockSpec((tm, out), lambda i: (i, 0)),
        compiler_params=pltpu.CompilerParams(
            dimension_semantics=("parallel",),
            vmem_limit_bytes=_VMEM_LIMIT,
        ),
    )(x, w, b)


# ----------------------------------------------------------------------------
# Kernel 2: flash-style multi-head attention.
#   q_p: (B, Nq, C)  k_p/v_p: (B, Nk, C)  ->  o: (B, Nq, C)   (C = H * d)
# Grid (B, Nq//tq, Nk//tk); the Nk axis is innermost and "arbitrary".
# Per-head online softmax state lives in VMEM scratch; the output is written
# once per q tile as a single lane-dense (tq, C) block.
# q is pre-scaled by 1/sqrt(d) (folded into Wq/bq in the wrapper).
# ----------------------------------------------------------------------------
def _flash_mha_kernel(q_ref, k_ref, v_ref, o_ref, m_sc, l_sc, acc_sc,
                      *, num_heads, nk_total, block_k):
    ki = pl.program_id(2)

    @pl.when(ki == 0)
    def _():
        m_sc[...] = jnp.full(m_sc.shape, -jnp.inf, jnp.float32)
        l_sc[...] = jnp.zeros(l_sc.shape, jnp.float32)
        acc_sc[...] = jnp.zeros(acc_sc.shape, jnp.float32)

    q = q_ref[0]                      # (tq, C), already scaled by 1/sqrt(d)
    k = k_ref[0]                      # (tk, C)
    v = v_ref[0]                      # (tk, C)
    d = q.shape[-1] // num_heads

    needs_mask = (nk_total % block_k) != 0   # static; only for ragged Nk
    if needs_mask:
        # Column mask for the scores of the (partial) last kv tile.
        col = ki * block_k + lax.broadcasted_iota(
            jnp.int32, (q.shape[0], block_k), 1)
        valid = col < nk_total
        # Zero out padded v rows so garbage (inf/NaN) in the padded region
        # can never leak into the accumulator via 0 * inf.
        row = ki * block_k + lax.broadcasted_iota(
            jnp.int32, (block_k, 1), 0)
        v = jnp.where(row < nk_total, v, 0.0).astype(v.dtype)

    for h in range(num_heads):
        lo = h * d
        qh = q[:, lo:lo + d]
        kh = k[:, lo:lo + d]
        vh = v[:, lo:lo + d]

        # Contract the last dims of q and k directly — no k.T materialization.
        s = lax.dot_general(qh, kh, (((1,), (1,)), ((), ())),
                            preferred_element_type=jnp.float32)   # (tq, tk)
        if needs_mask:
            s = jnp.where(valid, s, -jnp.inf)

        m_prev = m_sc[h]                                          # (tq, 1)
        m_new = jnp.maximum(m_prev, jnp.max(s, axis=-1, keepdims=True))
        alpha = jnp.exp(m_prev - m_new)
        p = jnp.exp(s - m_new)
        l_sc[h] = alpha * l_sc[h] + jnp.sum(p, axis=-1, keepdims=True)
        acc_sc[h] = alpha * acc_sc[h] + jnp.dot(
            p.astype(vh.dtype), vh, preferred_element_type=jnp.float32)
        m_sc[h] = m_new

    @pl.when(ki == pl.num_programs(2) - 1)
    def _():
        inv = pl.reciprocal(l_sc[...], approx=True)               # (H, tq, 1)
        heads = [(acc_sc[h] * inv[h]).astype(o_ref.dtype)
                 for h in range(num_heads)]
        # single lane-dense store of the recombined heads: (tq, H*d)
        o_ref[0] = jnp.concatenate(heads, axis=-1)


def multihead_attention(q_p, k_p, v_p, num_heads):
    B, Nq, C = q_p.shape
    Nk = k_p.shape[1]
    d = C // num_heads
    tq = min(_ATTN_BLOCK_Q, Nq)
    tk = min(_ATTN_BLOCK_K, Nk)

    kernel = functools.partial(
        _flash_mha_kernel, num_heads=num_heads, nk_total=Nk, block_k=tk)

    return pl.pallas_call(
        kernel,
        out_shape=jax.ShapeDtypeStruct((B, Nq, C), q_p.dtype),
        grid=(B, pl.cdiv(Nq, tq), pl.cdiv(Nk, tk)),
        in_specs=[
            pl.BlockSpec((1, tq, C), lambda b, i, j: (b, i, 0)),
            pl.BlockSpec((1, tk, C), lambda b, i, j: (b, j, 0)),
            pl.BlockSpec((1, tk, C), lambda b, i, j: (b, j, 0)),
        ],
        out_specs=pl.BlockSpec((1, tq, C), lambda b, i, j: (b, i, 0)),
        scratch_shapes=[
            pltpu.VMEM((num_heads, tq, 1), jnp.float32),   # running max  m
            pltpu.VMEM((num_heads, tq, 1), jnp.float32),   # running sum  l
            pltpu.VMEM((num_heads, tq, d), jnp.float32),   # accumulator
        ],
        compiler_params=pltpu.CompilerParams(
            dimension_semantics=("parallel", "parallel", "arbitrary"),
            vmem_limit_bytes=_VMEM_LIMIT,
        ),
    )(q_p, k_p, v_p)


# ----------------------------------------------------------------------------
# Full module forward.
# ----------------------------------------------------------------------------
def attention_forward(params, q, k, v, num_heads):
    B, Nq, E = q.shape
    Nk = k.shape[1]
    C = params["wq"].shape[1]          # internal_dim
    d = C // num_heads
    scale = 1.0 / math.sqrt(d)

    # Fold the softmax scale into the q projection (zero in-kernel cost).
    wq = params["wq"] * scale
    bq = params["bq"] * scale

    if (q is k) and (k is v):
        # Self-attention: fuse the three projections into one pallas_call —
        # x is read from HBM once and a single matmul feeds q/k/v.
        w_qkv = jnp.concatenate([wq, params["wk"], params["wv"]], axis=1)
        b_qkv = jnp.concatenate([bq, params["bk"], params["bv"]], axis=1)
        qkv = linear(q.reshape(B * Nq, E), w_qkv, b_qkv).reshape(B, Nq, 3 * C)
        q_p = qkv[..., :C]
        k_p = qkv[..., C:2 * C]
        v_p = qkv[..., 2 * C:]
    else:
        # General (cross-attention) path: q, k, v are distinct tensors.
        q_p = linear(q.reshape(B * Nq, E), wq, bq).reshape(B, Nq, C)
        k_p = linear(k.reshape(B * Nk, E), params["wk"], params["bk"]).reshape(B, Nk, C)
        v_p = linear(v.reshape(B * Nk, E), params["wv"], params["bv"]).reshape(B, Nk, C)

    # Flash attention; output already comes back in (B, Nq, H*d) layout,
    # so no separate-heads / recombine-heads transposes are needed.
    o = multihead_attention(q_p, k_p, v_p, num_heads)

    out = linear(o.reshape(B * Nq, C), params["wo"], params["bo"])
    return out.reshape(B, Nq, E)


def init_params(key, embedding_dim, internal_dim):
    # PyTorch Linear stores W as (out, in); we store the transposed (in, out)
    # form used directly by the kernels.
    ks = jax.random.split(key, 8)

    def u(kk, shape, fan_in):
        bound = 1.0 / math.sqrt(fan_in)
        return jax.random.uniform(kk, shape, jnp.float32, -bound, bound)

    return {
        "wq": u(ks[0], (embedding_dim, internal_dim), embedding_dim),
        "bq": u(ks[1], (1, internal_dim), embedding_dim),
        "wk": u(ks[2], (embedding_dim, internal_dim), embedding_dim),
        "bk": u(ks[3], (1, internal_dim), embedding_dim),
        "wv": u(ks[4], (embedding_dim, internal_dim), embedding_dim),
        "bv": u(ks[5], (1, internal_dim), embedding_dim),
        "wo": u(ks[6], (internal_dim, embedding_dim), internal_dim),
        "bo": u(ks[7], (1, embedding_dim), internal_dim),
    }


def reference_forward(params, q, k, v, num_heads):
    """Pure-JAX reference mirroring the PyTorch forward, for verification."""
    B, Nq, E = q.shape
    Nk = k.shape[1]
    C = params["wq"].shape[1]
    d = C // num_heads
    qp = q @ params["wq"] + params["bq"]
    kp = k @ params["wk"] + params["bk"]
    vp = v @ params["wv"] + params["bv"]
    qh = qp.reshape(B, Nq, num_heads, d).transpose(0, 2, 1, 3)
    kh = kp.reshape(B, Nk, num_heads, d).transpose(0, 2, 1, 3)
    vh = vp.reshape(B, Nk, num_heads, d).transpose(0, 2, 1, 3)
    attn = jnp.einsum("bhqd,bhkd->bhqk", qh, kh) / math.sqrt(d)
    attn = jax.nn.softmax(attn, axis=-1)
    oh = jnp.einsum("bhqk,bhkd->bhqd", attn, vh)
    o = oh.transpose(0, 2, 1, 3).reshape(B, Nq, C)
    return o @ params["wo"] + params["bo"]


if __name__ == "__main__":
    # Small shapes consistent with the module's forward:
    #   embedding_dim=32, num_heads=4, downsample_rate=1, batch=2, seq=8
    B, Nq, Nk, E, H = 2, 8, 8, 32, 4
    downsample_rate = 1
    internal_dim = E // downsample_rate

    key = jax.random.PRNGKey(0)
    kq, kk, kv, kp = jax.random.split(key, 4)
    q = jax.random.normal(kq, (B, Nq, E), jnp.float32)
    k = jax.random.normal(kk, (B, Nk, E), jnp.float32)
    v = jax.random.normal(kv, (B, Nk, E), jnp.float32)
    params = init_params(kp, E, internal_dim)

    # Tolerance is slightly relaxed vs. the f32 path because the softmax
    # denominator uses the (EUP) approximate reciprocal.
    ATOL = RTOL = 2e-3

    # 1) Cross-attention path (distinct q / k / v -> separate projections).
    out = attention_forward(params, q, k, v, H)
    out = jax.block_until_ready(out)
    ref = reference_forward(params, q, k, v, H)
    assert out.shape == (B, Nq, E), out.shape
    assert jnp.allclose(out, ref, atol=ATOL, rtol=RTOL), "cross-attn mismatch"

    # 2) Self-attention path (q is k is v -> fused QKV projection).
    out_self = attention_forward(params, q, q, q, H)
    out_self = jax.block_until_ready(out_self)
    ref_self = reference_forward(params, q, q, q, H)
    assert jnp.allclose(out_self, ref_self, atol=ATOL, rtol=RTOL), "self-attn mismatch"

    print("KERNEL_OK")
</pallas_src>

<mosaic_0001>
module attributes {stable_mosaic.version = 11 : i64} {
  func.func @_linear_kernel(%arg0: i32, %arg1: memref<16x32xf32, #tpu.memory_space<vmem>>, %arg2: memref<32x32xf32, #tpu.memory_space<vmem>>, %arg3: memref<1x32xf32, #tpu.memory_space<vmem>>, %arg4: memref<16x32xf32, #tpu.memory_space<vmem>>) attributes {dimension_semantics = [#tpu.dimension_semantics<parallel>], iteration_bounds = array<i64: 1>, scalar_prefetch = 0 : i64, scratch_operands = 0 : i64, tpu.core_type = #tpu.core_type<tc>, window_params = [{transform_indices = @transform_0, window_bounds = array<i64: 16, 32>}, {pipeline_mode = #tpu.pipeline_mode<synchronous>, transform_indices = @transform_1, window_bounds = array<i64: 32, 32>}, {pipeline_mode = #tpu.pipeline_mode<synchronous>, transform_indices = @transform_2, window_bounds = array<i64: 1, 32>}, {transform_indices = @transform_3, window_bounds = array<i64: 16, 32>}]} {
    %c0 = arith.constant 0 : index
    %c0_0 = arith.constant 0 : index
    %0 = vector.load %arg1[%c0, %c0_0] : memref<16x32xf32, #tpu.memory_space<vmem>>, vector<16x32xf32>
    %c0_1 = arith.constant 0 : index
    %c0_2 = arith.constant 0 : index
    %1 = vector.load %arg2[%c0_1, %c0_2] : memref<32x32xf32, #tpu.memory_space<vmem>>, vector<32x32xf32>
    %cst = arith.constant dense<0.000000e+00> : vector<16x32xf32>
    %2 = tpu.matmul %0, %1, %cst {dimension_numbers = #tpu.dot_dimension_numbers<[1], [0], [0], [1], [0, 0, 1, 1], [], []>} : vector<16x32xf32>, vector<32x32xf32>, vector<16x32xf32> -> vector<16x32xf32>
    %c0_3 = arith.constant 0 : index
    %c0_4 = arith.constant 0 : index
    %3 = vector.load %arg3[%c0_3, %c0_4] : memref<1x32xf32, #tpu.memory_space<vmem>>, vector<1x32xf32>
    %4 = vector.broadcast %3 : vector<1x32xf32> to vector<16x32xf32>
    %5 = arith.addf %2, %4 : vector<16x32xf32>
    %c0_5 = arith.constant 0 : index
    %c0_6 = arith.constant 0 : index
    %6 = vector.load %arg4[%c0_5, %c0_6] : memref<16x32xf32, #tpu.memory_space<vmem>>, vector<16x32xf32>
    tpu.vector_store %arg4[%c0_5, %c0_6], %5 {strides = array<i32>} : memref<16x32xf32, #tpu.memory_space<vmem>>, vector<16x32xf32>,
    return
  }
  func.func @transform_0(%arg0: i32) -> (i32, i32) {
    %c0_i32 = arith.constant 0 : i32
    %c0_i32_0 = arith.constant 0 : i32
    return %arg0, %c0_i32 : i32, i32
  }
  func.func @transform_1(%arg0: i32) -> (i32, i32) {
    %c0_i32 = arith.constant 0 : i32
    %c0_i32_0 = arith.constant 0 : i32
    %c0_i32_1 = arith.constant 0 : i32
    return %c0_i32, %c0_i32_0 : i32, i32
  }
  func.func @transform_2(%arg0: i32) -> (i32, i32) {
    %c0_i32 = arith.constant 0 : i32
    %c0_i32_0 = arith.constant 0 : i32
    %c0_i32_1 = arith.constant 0 : i32
    return %c0_i32, %c0_i32_0 : i32, i32
  }
  func.func @transform_3(%arg0: i32) -> (i32, i32) {
    %c0_i32 = arith.constant 0 : i32
    %c0_i32_0 = arith.constant 0 : i32
    return %arg0, %c0_i32 : i32, i32
  }
}

</mosaic_0001>

<bundles_post_ra>
// kernel: tpu_custom_call.1
= control target key start
LH: loop header
LB: loop body
LE: loop exit
PB: predicated region body
PF: predicated region fallthrough
CT: control target
= control target key end

     0   :  { %8 = vsyncpa [#allocation3], 0  ;;  %s340_s0 = inlined_call_operand.hbm [shape: f32[16,32], index: 0, kind: input, shape index: {}]   ;;  %s341_s1 = inlined_call_operand.hbm [shape: f32[32,32], index: 1, kind: input, shape index: {}]   ;;  %s342_s2 = inlined_call_operand.vmem [shape: f32[1,32], index: 2, kind: input, shape index: {}]   ;;  %s343_s3 = inlined_call_operand.hbm [shape: f32[16,32], index: 3, kind: output, shape index: {}]  }
   0x1   :  { %9 = vsyncpa [#allocation6], 0 }
   0x2   :  { %10 = vsyncpa [#allocation4], 0  ;;  %s263_s12 = smov [#allocation2]   ;;  %s191_s16 = scalar_lea.hbm %s340_s0, 256 }
   0x3   :  { %s16_s13 = sshll.u32 %s263_s12, 4  ;;  %p192_p0 = scmp.ne.s32.totalorder %s340_s0, %s191_s16  ;;  %s17_s13 = int_to_ptr.vmem [resolvable:$true] %s16_s13 }
   0x4   :  { %p195_p1 = scmp.lt.u32.totalorder %s191_s16, %s340_s0 }
   0x6   :  { %p197_p2 = pnand %p195_p1, %p192_p0 }
   0x8   :  { %200 = shalt.err (!%p197_p2)
}
   0x9   :  { %s201_s21 = scalar_lea.vmem %s17_s13, 256  ;;  %p206_p4 = scmp.lt.s32.totalorder %s17_s13, %s17_s13 }
   0xa   :  { %p202_p3 = scmp.ne.s32.totalorder %s17_s13, %s201_s21  ;;  %p207_p5 = scmp.lt.s32.totalorder %s201_s21, %s201_s21 }
   0xc   :  { %p208_p6 = por %p207_p5, %p206_p4 }
   0xe   :  { %p209_p7 = pnand %p208_p6, %p202_p3 }
  0x10   :  { %212 = shalt.err (!%p209_p7)
}
  0x11   :  { %s264_s22 = smov 128   ;;  %s265_s23 = smov 8  }
  0x12   :  { %22 = dma.hbm_to_vmem [thread:$0]  %s340_s0, 256, %s17_s13, [#allocation3], %s264_s22, %s264_s22, %s265_s23  }
  0x13   :  { %s266_s26 = smov [#allocation5]   ;;  %s213_s30 = scalar_lea.hbm %s341_s1, 512 }
  0x14   :  { %s28_s27 = sshll.u32 %s266_s26, 4  ;;  %p214_p8 = scmp.ne.s32.totalorder %s341_s1, %s213_s30  ;;  %s29_s27 = int_to_ptr.vmem [resolvable:$true] %s28_s27 }
  0x15   :  { %p217_p9 = scmp.lt.u32.totalorder %s213_s30, %s341_s1 }
  0x17   :  { %p219_p10 = pnand %p217_p9, %p214_p8 }
  0x19   :  { %222 = shalt.err (!%p219_p10)
}
  0x1a   :  { %s223_s8 = scalar_lea.vmem %s29_s27, 512  ;;  %p228_p12 = scmp.lt.s32.totalorder %s29_s27, %s29_s27 }
  0x1b   :  { %p224_p11 = scmp.ne.s32.totalorder %s29_s27, %s223_s8  ;;  %p229_p13 = scmp.lt.s32.totalorder %s223_s8, %s223_s8 }
  0x1d   :  { %p230_p0 = por %p229_p13, %p228_p12 }
  0x1f   :  { %p231_p1 = pnand %p230_p0, %p224_p11 }
  0x21   :  { %234 = shalt.err (!%p231_p1)
}
  0x22   :  { %34 = dma.hbm_to_vmem [thread:$0]  %s341_s1, 512, %s29_s27, [#allocation6], %s264_s22, %s264_s22, %s265_s23  }
  0x23   :  { %257 = dma.done.wait [#allocation3], 256  }
  0x24   :  { %258 = vsyncadd [#allocation3], 4294967040 }
  0x25   :  { %259 = dma.done.wait [#allocation6], 512  }
  0x26   :  { %260 = vsyncadd [#allocation6], 4294966784  ;;  %vm56_vm0 = vcmask 261120   ;;  %v45_v0 = vld [vmem:[#allocation5] sm:$0xff]  ;;  %v46_v1 = vld [vmem:[#allocation5 + $0x8] sm:$0xff]  ;;  %s267_s11 = smov [#allocation7]  }
  0x27   :  { %v47_v2 = vld [vmem:[#allocation5 + $0x10] sm:$0xff]  ;;  %v178_v3 = vpack.c.bf16 %v46_v1, %v45_v0  ;;  %v48_v4 = vld [vmem:[#allocation5 + $0x18] sm:$0xff]  ;;  %s145_s12 = sshll.u32 %s267_s11, 4  ;;  %s146_s12 = int_to_ptr.vmem [resolvable:$true] %s145_s12 }
  0x28   :  { %v43_v5 = vld [vmem:[#allocation2] sm:$0xff]  ;;  %v182_v6 = vpack.c.bf16 %v48_v4, %v47_v2  ;;  %v44_v7 = vld [vmem:[#allocation2 + $0x8] sm:$0xff]  ;;  %s235_s13 = scalar_lea.vmem %s146_s12, 256  ;;  %p240_p3 = scmp.lt.s32.totalorder %s146_s12, %s146_s12 }
  0x29   :  { %175 = vmatprep.mubr.msk.f32.mxu0 %vm56_vm0, %v43_v5  ;;  %179 = vmatprep.subr.bf16.mxu0 %v178_v3  ;;  %v158_v8 = vld [vmem:[%s342_s2] ss:$0 sm:$0xff]  ;;  %p236_p2 = scmp.ne.s32.totalorder %s146_s12, %s235_s13  ;;  %p241_p4 = scmp.lt.s32.totalorder %s235_s13, %s235_s13 }
  0x2a   :  { %181 = vmatpush3.bf16.msra.mxu0 %v178_v3 }
  0x2b   :  { %183 = vmatprep.subr.bf16.mxu0 %v182_v6  ;;  %p242_p5 = por %p241_p4, %p240_p3 }
  0x2d   :  { %p243_p6 = pnand %p242_p5, %p236_p2 }
  0x2e   :  { %185 = vmatpush3.bf16.msra.mxu0 %v182_v6 }
  0x31   :  { %176 = vmatmul.mubr.msk.f32.vlgmr.msra.gmra.mrb[0].mxu0 %vm56_vm0, %v44_v7 }
 0x104   :  { %v177_v9 = vpop.f32.mrb[0].mxu0 }
 0x105   :  { %v135_v10 = vadd.f32 %v177_v9, %v158_v8  ;;  %v129_v11 = vpop.f32.mrb[1].mxu0 }
 0x106   :  { %v130_v12 = vadd.f32 %v158_v8, %v129_v11 }
 0x107   :  { %139 = vst.msk [vmem:[#allocation7 + $0x8] sm:$0xff] %vm56_vm0, %v135_v10 }
 0x108   :  { %138 = vst.msk [vmem:[#allocation7] sm:$0xff] %vm56_vm0, %v130_v12 }
 0x109   :  { %246 = shalt.err (!%p243_p6)
}
 0x10a   :  { %s247_s15 = scalar_lea.hbm %s343_s3, 256 }
 0x10b   :  { %p248_p7 = scmp.ne.s32.totalorder %s343_s3, %s247_s15  ;;  %p251_p8 = scmp.lt.u32.totalorder %s247_s15, %s343_s3 }
 0x10d   :  { %p253_p9 = pnand %p251_p8, %p248_p7 }
 0x10f   :  { %256 = shalt.err (!%p253_p9)
}
 0x110   :  { %151 = dma.vmem_to_hbm [thread:$0]  %s146_s12, 256, %s343_s3, [#allocation4], %s264_s22, %s264_s22, %s265_s23  }
 0x111   :  { %261 = dma.done.wait [#allocation4], 256  }
 0x112   :  { %262 = vsyncadd [#allocation4], 4294967040 }
 0x113   :  { %155 = vsyncpa [#allocation3], 1 }
 0x114   :  { %156 = vsyncpa [#allocation6], 1 }
 0x115   :  { %157 = vsyncpa [#allocation4], 1 }

</bundles_post_ra>
